<compile_context>
chip_gen: v7x
topology: tpu7x:2x2x1
jax: 0.10.0
libtpu: 0.0.40
codegen_flags: <defaults>
</compile_context>

<pallas_src>
import functools

import jax
import jax.numpy as jnp
from jax import lax
from jax.experimental import pallas as pl
from jax.experimental.pallas import tpu as pltpu

ALPHA = 0.2
BETA = 0.8
EPS = 1e-6


def _tversky_tp_kernel(x_ref, t_ref, tp_ref, acc_ref, *, nblk, npl):
    """Accumulate per-batch softmax-at-target ("true positive") mass.

    x_ref:   (B, C, TLS, 128) logits tile, native dtype
    t_ref:   (B, TLS, 128)    int8/int32 class ids (pad value == C)
    tp_ref:  (1, B, 128)      per-split, lane-partial tp output (f32)
    acc_ref: (B, 8|1, 128)    f32 accumulator scratch
    """
    B, C, tls, lanes = x_ref.shape
    s = pl.program_id(0)          # split index ("parallel", v7x 2 TCs)
    l = pl.program_id(1)          # tile index within split ("arbitrary")

    @pl.when(l == 0)
    def _():
        acc_ref[...] = jnp.zeros_like(acc_ref)

    t = t_ref[...].astype(jnp.int32)                  # (B, TLS, 128)

    # Pass 1: per-position max over classes (elementwise, unrolled over C).
    m = x_ref[:, 0].astype(jnp.float32)
    for c in range(1, C):
        m = jnp.maximum(m, x_ref[:, c].astype(jnp.float32))

    # Pass 2: exp-sum (softmax denominator) and exp-at-target (one-hot gather
    # without ever building the one-hot tensor).
    denom = None
    e_t = None
    for c in range(C):
        e_c = jnp.exp(x_ref[:, c].astype(jnp.float32) - m)
        denom = e_c if denom is None else denom + e_c
        hit = jnp.where(t == c, e_c, 0.0)
        e_t = hit if e_t is None else e_t + hit

    # softmax(target) = e_t / denom; approx reciprocal (EUP) + 1 Newton step.
    r = pl.reciprocal(denom, approx=True)
    r = r * (2.0 - denom * r)
    tp_elem = e_t * r                                  # (B, TLS, 128)

    # Mask the garbage tail of a partial last tile (static gate: only emitted
    # when nblk is not a multiple of TLS).
    if nblk % tls != 0:
        valid = nblk - (s * npl + l) * tls             # traced scalar
        blk = lax.broadcasted_iota(jnp.int32, tp_elem.shape, 1)
        tp_elem = jnp.where(blk < valid, tp_elem, 0.0)

    # Reduce the tile over the sub-block axis with pure VALU adds into a tiny
    # fixed-size accumulator (no per-tile XLU, scratch stays O(B)).
    if tls % 8 == 0:
        part = jnp.sum(tp_elem.reshape(B, tls // 8, 8, lanes), axis=1)
    else:  # only possible for a single full tile of a tiny input
        part = jnp.sum(tp_elem, axis=1, keepdims=True)
    acc_ref[...] += part

    @pl.when(l == npl - 1)
    def _():
        # One sublane reduce per split; the cross-lane reduce is done in JAX.
        tp_ref[...] = jnp.sum(acc_ref[...], axis=1)[None]    # (1, B, 128)


def _gen_params():
    """Generation-aware VMEM budget and TensorCore count (defensive)."""
    kind = ""
    try:
        kind = jax.devices()[0].device_kind.lower()
    except Exception:
        pass
    two_tc = "7" in kind                     # v7x parts: 2 TCs, 64 MiB VMEM
    if two_tc or "v6" in kind:
        budget = 20 << 20                    # v6e/v7x: default scoped 32 MiB
    else:
        budget = 10 << 20                    # v5e/unknown: default scoped 16 MiB
    return budget, two_tc


def _pick_tile_blocks(nblk, B, C, x_itemsize, t_itemsize, budget):
    """Pick TLS (number of 128-lane blocks per tile) from the VMEM budget.

    Padding-accurate: with the (..., TLS, 128) layout and TLS a multiple of 32
    there is no sublane padding for f32/bf16 logits or int8 targets.
    """
    if nblk <= 32:
        return nblk
    per_blk = (2 * B * C * 128 * x_itemsize    # double-buffered logits
               + 2 * B * 128 * t_itemsize      # double-buffered targets
               + 6 * B * 128 * 4)              # f32 compute temps (m, denom, e_t, ...)
    fixed = (1 << 20) + B * 8 * 128 * 4        # internal scratch + accumulator
    tls = max(32, int((budget - fixed) // per_blk))
    if tls >= nblk:
        return nblk
    return max(32, (tls // 32) * 32)


def tversky_loss(logits, target, *, tile_blocks=None, nsplit=None):
    """logits: (B, C, L) float; target: (B, L) int class ids in [0, C)."""
    B, C, L = logits.shape
    x_itemsize = jnp.dtype(logits.dtype).itemsize

    # Pad the spatial axis to a multiple of 128.  Padded targets get class id
    # C, which matches no real class -> exact zero tp contribution.
    Lp = ((L + 127) // 128) * 128
    tgt = target
    if Lp != L:
        logits = jnp.pad(logits, ((0, 0), (0, 0), (0, Lp - L)))
        tgt = jnp.pad(tgt, ((0, 0), (0, Lp - L)), constant_values=C)
    nblk = Lp // 128

    # Narrow targets on the wire; upcast after the VMEM load.
    t_dtype = jnp.int8 if C <= 127 else jnp.int32
    t_itemsize = jnp.dtype(t_dtype).itemsize

    x4 = logits.reshape(B, C, nblk, 128)
    t3 = tgt.astype(t_dtype).reshape(B, nblk, 128)

    budget, two_tc = _gen_params()
    tls = (_pick_tile_blocks(nblk, B, C, x_itemsize, t_itemsize, budget)
           if tile_blocks is None else int(tile_blocks))
    assert tls == nblk or tls % 8 == 0, "tile_blocks must equal nblk or be a multiple of 8"
    n_tiles = pl.cdiv(nblk, tls)

    # 2-way core split only when the part has 2 TensorCores and the tile count
    # is large and even (no phantom tiles, no wasted DMA on 1-TC parts).
    if nsplit is None:
        nsplit = 2 if (two_tc and n_tiles >= 8 and n_tiles % 2 == 0) else 1
    if n_tiles % nsplit != 0:
        nsplit = 1
    npl = n_tiles // nsplit

    acc_rows = 8 if tls % 8 == 0 else 1

    vmem_need = (2 * B * C * tls * 128 * x_itemsize
                 + 2 * B * tls * 128 * t_itemsize
                 + 6 * B * tls * 128 * 4
                 + B * acc_rows * 128 * 4)
    vmem_limit = int(min(32 << 20, max(vmem_need + (4 << 20), 16 << 20)))

    kernel = functools.partial(_tversky_tp_kernel, nblk=nblk, npl=npl)

    partial_tp = pl.pallas_call(
        kernel,
        out_shape=jax.ShapeDtypeStruct((nsplit, B, 128), jnp.float32),
        grid=(nsplit, npl),
        in_specs=[
            pl.BlockSpec((B, C, tls, 128), lambda s, l: (0, 0, s * npl + l, 0)),
            pl.BlockSpec((B, tls, 128), lambda s, l: (0, s * npl + l, 0)),
        ],
        out_specs=pl.BlockSpec((1, B, 128), lambda s, l: (s, 0, 0)),
        scratch_shapes=[pltpu.VMEM((B, acc_rows, 128), jnp.float32)],
        compiler_params=pltpu.CompilerParams(
            dimension_semantics=("parallel", "arbitrary"),
            vmem_limit_bytes=vmem_limit),
    )(x4, t3)

    # Tiny epilogue in plain JAX (B scalars): softmax rows and one-hot rows
    # each sum to 1 over the class axis, so fp = L - tp and fn = L - tp.
    tp = jnp.sum(partial_tp, axis=(0, 2))            # (B,)
    n = jnp.float32(L)
    fp = n - tp
    fn = n - tp
    tversky = tp / (tp + ALPHA * fp + BETA * fn + EPS)
    return jnp.mean(1.0 - tversky)


def _reference_loss(logits, target):
    """Pure-JAX reference mirroring the PyTorch forward exactly (f32 math)."""
    C = logits.shape[1]
    sm = jax.nn.softmax(logits.astype(jnp.float32), axis=1)
    sm = jnp.swapaxes(sm, 1, 2)                          # (B, L, C)
    oh = jax.nn.one_hot(target, C, dtype=jnp.float32)    # (B, L, C)
    tp = jnp.sum(sm * oh, axis=(1, 2))
    fp = jnp.sum(sm * (1.0 - oh), axis=(1, 2))
    fn = jnp.sum((1.0 - sm) * oh, axis=(1, 2))
    tv = tp / (tp + ALPHA * fp + BETA * fn + EPS)
    return jnp.mean(1.0 - tv)


def _check(loss, logits, target, tol=1e-4):
    jax.block_until_ready(loss)
    ref = _reference_loss(logits, target)
    assert abs(float(loss) - float(ref)) < tol, (float(loss), float(ref))


if __name__ == "__main__":
    key = jax.random.PRNGKey(0)

    # Case 1: nominal small shape (B=2, C=4, 16x16), single full tile.
    B, C, H, W = 2, 4, 16, 16
    L = H * W
    k1, k2, key = jax.random.split(key, 3)
    logits = jax.random.normal(k1, (B, C, H, W), jnp.float32).reshape(B, C, L)
    target = jax.random.randint(k2, (B, H, W), 0, C, jnp.int32).reshape(B, L)
    _check(tversky_loss(logits, target), logits, target)

    # Case 2: non-128-aligned spatial size -> wrapper padding path (pad target=C).
    B, C, H, W = 2, 4, 16, 20
    L = H * W
    k1, k2, key = jax.random.split(key, 3)
    logits = jax.random.normal(k1, (B, C, H, W), jnp.float32).reshape(B, C, L)
    target = jax.random.randint(k2, (B, H, W), 0, C, jnp.int32).reshape(B, L)
    _check(tversky_loss(logits, target), logits, target)

    # Case 3: multi-tile with a partial last tile (nblk=48, TLS=32 -> tail of 16):
    # exercises cross-tile accumulation and the in-kernel sub-block mask.
    B, C, H, W = 2, 4, 64, 96
    L = H * W
    k1, k2, key = jax.random.split(key, 3)
    logits = jax.random.normal(k1, (B, C, H, W), jnp.float32).reshape(B, C, L)
    target = jax.random.randint(k2, (B, H, W), 0, C, jnp.int32).reshape(B, L)
    _check(tversky_loss(logits, target, tile_blocks=32), logits, target)

    # Case 4: forced 2-way split (even tile count) -> per-split partial outputs.
    B, C, H, W = 2, 4, 64, 128
    L = H * W
    k1, k2, key = jax.random.split(key, 3)
    logits = jax.random.normal(k1, (B, C, H, W), jnp.float32).reshape(B, C, L)
    target = jax.random.randint(k2, (B, H, W), 0, C, jnp.int32).reshape(B, L)
    _check(tversky_loss(logits, target, tile_blocks=32, nsplit=2), logits, target)

    # Case 5: bf16 logits on the wire, f32 math inside the kernel.
    B, C, H, W = 2, 4, 16, 16
    L = H * W
    k1, k2, key = jax.random.split(key, 3)
    logits = jax.random.normal(k1, (B, C, H, W), jnp.float32).astype(jnp.bfloat16)
    logits = logits.reshape(B, C, L)
    target = jax.random.randint(k2, (B, H, W), 0, C, jnp.int32).reshape(B, L)
    _check(tversky_loss(logits, target), logits, target)

    print("KERNEL_OK")
</pallas_src>

<mosaic_0001>
module attributes {stable_mosaic.version = 11 : i64} {
  func.func @_tversky_tp_kernel(%arg0: i32, %arg1: i32, %arg2: memref<2x4x2x128xf32, #tpu.memory_space<vmem>>, %arg3: memref<2x2x128xi8, #tpu.memory_space<vmem>>, %arg4: memref<1x2x128xf32, #tpu.memory_space<vmem>>, %arg5: memref<2x1x128xf32, #tpu.memory_space<vmem>>) attributes {dimension_semantics = [#tpu.dimension_semantics<parallel>, #tpu.dimension_semantics<arbitrary>], iteration_bounds = array<i64: 1, 1>, scalar_prefetch = 0 : i64, scratch_operands = 1 : i64, tpu.core_type = #tpu.core_type<tc>, window_params = [{transform_indices = @transform_0, window_bounds = array<i64: 2, 4, 2, 128>}, {transform_indices = @transform_1, window_bounds = array<i64: 2, 2, 128>}, {transform_indices = @transform_2, window_bounds = array<i64: 1, 2, 128>}]} {
    %c0_i32 = arith.constant 0 : i32
    %0 = arith.cmpi eq, %arg1, %c0_i32 : i32
    %1 = arith.extui %0 : i1 to i32
    %c0_i32_0 = arith.constant 0 : i32
    %2 = arith.cmpi ne, %1, %c0_i32_0 : i32
    scf.if %2 {
      %cst_46 = arith.constant 0.000000e+00 : f32
      %68 = vector.broadcast %cst_46 : f32 to vector<2x1x128xf32>
      %c0_47 = arith.constant 0 : index
      %c0_48 = arith.constant 0 : index
      %c0_49 = arith.constant 0 : index
      %69 = vector.load %arg5[%c0_47, %c0_48, %c0_49] : memref<2x1x128xf32, #tpu.memory_space<vmem>>, vector<2x1x128xf32>
      tpu.vector_store %arg5[%c0_47, %c0_48, %c0_49], %68 {strides = array<i32>} : memref<2x1x128xf32, #tpu.memory_space<vmem>>, vector<2x1x128xf32>,
    } else {
    }
    %c0 = arith.constant 0 : index
    %c0_1 = arith.constant 0 : index
    %c0_2 = arith.constant 0 : index
    %3 = vector.load %arg3[%c0, %c0_1, %c0_2] : memref<2x2x128xi8, #tpu.memory_space<vmem>>, vector<2x2x128xi8>
    %4 = arith.extsi %3 : vector<2x2x128xi8> to vector<2x2x128xi32>
    %c0_3 = arith.constant 0 : index
    %c0_4 = arith.constant 0 : index
    %c0_5 = arith.constant 0 : index
    %c0_6 = arith.constant 0 : index
    %5 = vector.load %arg2[%c0_3, %c0_4, %c0_5, %c0_6] : memref<2x4x2x128xf32, #tpu.memory_space<vmem>>, vector<2x1x2x128xf32>
    %6 = vector.shape_cast %5 : vector<2x1x2x128xf32> to vector<2x2x128xf32>
    %c0_7 = arith.constant 0 : index
    %c1 = arith.constant 1 : index
    %c0_8 = arith.constant 0 : index
    %c0_9 = arith.constant 0 : index
    %7 = vector.load %arg2[%c0_7, %c1, %c0_8, %c0_9] : memref<2x4x2x128xf32, #tpu.memory_space<vmem>>, vector<2x1x2x128xf32>
    %8 = vector.shape_cast %7 : vector<2x1x2x128xf32> to vector<2x2x128xf32>
    %9 = arith.maximumf %6, %8 : vector<2x2x128xf32>
    %c0_10 = arith.constant 0 : index
    %c2 = arith.constant 2 : index
    %c0_11 = arith.constant 0 : index
    %c0_12 = arith.constant 0 : index
    %10 = vector.load %arg2[%c0_10, %c2, %c0_11, %c0_12] : memref<2x4x2x128xf32, #tpu.memory_space<vmem>>, vector<2x1x2x128xf32>
    %11 = vector.shape_cast %10 : vector<2x1x2x128xf32> to vector<2x2x128xf32>
    %12 = arith.maximumf %9, %11 : vector<2x2x128xf32>
    %c0_13 = arith.constant 0 : index
    %c3 = arith.constant 3 : index
    %c0_14 = arith.constant 0 : index
    %c0_15 = arith.constant 0 : index
    %13 = vector.load %arg2[%c0_13, %c3, %c0_14, %c0_15] : memref<2x4x2x128xf32, #tpu.memory_space<vmem>>, vector<2x1x2x128xf32>
    %14 = vector.shape_cast %13 : vector<2x1x2x128xf32> to vector<2x2x128xf32>
    %15 = arith.maximumf %12, %14 : vector<2x2x128xf32>
    %c0_16 = arith.constant 0 : index
    %c0_17 = arith.constant 0 : index
    %c0_18 = arith.constant 0 : index
    %c0_19 = arith.constant 0 : index
    %16 = vector.load %arg2[%c0_16, %c0_17, %c0_18, %c0_19] : memref<2x4x2x128xf32, #tpu.memory_space<vmem>>, vector<2x1x2x128xf32>
    %17 = vector.shape_cast %16 : vector<2x1x2x128xf32> to vector<2x2x128xf32>
    %18 = arith.subf %17, %15 : vector<2x2x128xf32>
    %19 = math.exp %18 : vector<2x2x128xf32>
    %c0_i32_20 = arith.constant 0 : i32
    %20 = vector.broadcast %c0_i32_20 : i32 to vector<2x2x128xi32>
    %21 = arith.cmpi eq, %4, %20 : vector<2x2x128xi32>
    %cst = arith.constant 0.000000e+00 : f32
    %22 = vector.broadcast %cst : f32 to vector<2x2x128xf32>
    %23 = arith.select %21, %19, %22 : vector<2x2x128xi1>, vector<2x2x128xf32>
    %c0_21 = arith.constant 0 : index
    %c1_22 = arith.constant 1 : index
    %c0_23 = arith.constant 0 : index
    %c0_24 = arith.constant 0 : index
    %24 = vector.load %arg2[%c0_21, %c1_22, %c0_23, %c0_24] : memref<2x4x2x128xf32, #tpu.memory_space<vmem>>, vector<2x1x2x128xf32>
    %25 = vector.shape_cast %24 : vector<2x1x2x128xf32> to vector<2x2x128xf32>
    %26 = arith.subf %25, %15 : vector<2x2x128xf32>
    %27 = math.exp %26 : vector<2x2x128xf32>
    %28 = arith.addf %19, %27 : vector<2x2x128xf32>
    %c1_i32 = arith.constant 1 : i32
    %29 = vector.broadcast %c1_i32 : i32 to vector<2x2x128xi32>
    %30 = arith.cmpi eq, %4, %29 : vector<2x2x128xi32>
    %cst_25 = arith.constant 0.000000e+00 : f32
    %31 = vector.broadcast %cst_25 : f32 to vector<2x2x128xf32>
    %32 = arith.select %30, %27, %31 : vector<2x2x128xi1>, vector<2x2x128xf32>
    %33 = arith.addf %23, %32 : vector<2x2x128xf32>
    %c0_26 = arith.constant 0 : index
    %c2_27 = arith.constant 2 : index
    %c0_28 = arith.constant 0 : index
    %c0_29 = arith.constant 0 : index
    %34 = vector.load %arg2[%c0_26, %c2_27, %c0_28, %c0_29] : memref<2x4x2x128xf32, #tpu.memory_space<vmem>>, vector<2x1x2x128xf32>
    %35 = vector.shape_cast %34 : vector<2x1x2x128xf32> to vector<2x2x128xf32>
    %36 = arith.subf %35, %15 : vector<2x2x128xf32>
    %37 = math.exp %36 : vector<2x2x128xf32>
    %38 = arith.addf %28, %37 : vector<2x2x128xf32>
    %c2_i32 = arith.constant 2 : i32
    %39 = vector.broadcast %c2_i32 : i32 to vector<2x2x128xi32>
    %40 = arith.cmpi eq, %4, %39 : vector<2x2x128xi32>
    %cst_30 = arith.constant 0.000000e+00 : f32
    %41 = vector.broadcast %cst_30 : f32 to vector<2x2x128xf32>
    %42 = arith.select %40, %37, %41 : vector<2x2x128xi1>, vector<2x2x128xf32>
    %43 = arith.addf %33, %42 : vector<2x2x128xf32>
    %c0_31 = arith.constant 0 : index
    %c3_32 = arith.constant 3 : index
    %c0_33 = arith.constant 0 : index
    %c0_34 = arith.constant 0 : index
    %44 = vector.load %arg2[%c0_31, %c3_32, %c0_33, %c0_34] : memref<2x4x2x128xf32, #tpu.memory_space<vmem>>, vector<2x1x2x128xf32>
    %45 = vector.shape_cast %44 : vector<2x1x2x128xf32> to vector<2x2x128xf32>
    %46 = arith.subf %45, %15 : vector<2x2x128xf32>
    %47 = math.exp %46 : vector<2x2x128xf32>
    %48 = arith.addf %38, %47 : vector<2x2x128xf32>
    %c3_i32 = arith.constant 3 : i32
    %49 = vector.broadcast %c3_i32 : i32 to vector<2x2x128xi32>
    %50 = arith.cmpi eq, %4, %49 : vector<2x2x128xi32>
    %cst_35 = arith.constant 0.000000e+00 : f32
    %51 = vector.broadcast %cst_35 : f32 to vector<2x2x128xf32>
    %52 = arith.select %50, %47, %51 : vector<2x2x128xi1>, vector<2x2x128xf32>
    %53 = arith.addf %43, %52 : vector<2x2x128xf32>
    %54 = tpu.reciprocal %48 {approx = true} : vector<2x2x128xf32> -> vector<2x2x128xf32>
    %55 = arith.mulf %48, %54 : vector<2x2x128xf32>
    %cst_36 = arith.constant 2.000000e+00 : f32
    %56 = vector.broadcast %cst_36 : f32 to vector<2x2x128xf32>
    %57 = arith.subf %56, %55 : vector<2x2x128xf32>
    %58 = arith.mulf %54, %57 : vector<2x2x128xf32>
    %59 = arith.mulf %53, %58 : vector<2x2x128xf32>
    %cst_37 = arith.constant dense<0.000000e+00> : vector<2x128xf32>
    %60 = vector.multi_reduction <add>, %59, %cst_37 [1] : vector<2x2x128xf32> to vector<2x128xf32>
    %61 = vector.shape_cast %60 : vector<2x128xf32> to vector<2x1x128xf32>
    %c0_38 = arith.constant 0 : index
    %c0_39 = arith.constant 0 : index
    %c0_40 = arith.constant 0 : index
    %62 = vector.load %arg5[%c0_38, %c0_39, %c0_40] : memref<2x1x128xf32, #tpu.memory_space<vmem>>, vector<2x1x128xf32>
    %63 = arith.addf %62, %61 : vector<2x1x128xf32>
    %c0_41 = arith.constant 0 : index
    %c0_42 = arith.constant 0 : index
    %c0_43 = arith.constant 0 : index
    %64 = vector.load %arg5[%c0_41, %c0_42, %c0_43] : memref<2x1x128xf32, #tpu.memory_space<vmem>>, vector<2x1x128xf32>
    tpu.vector_store %arg5[%c0_41, %c0_42, %c0_43], %63 {strides = array<i32>} : memref<2x1x128xf32, #tpu.memory_space<vmem>>, vector<2x1x128xf32>,
    %c0_i32_44 = arith.constant 0 : i32
    %65 = arith.cmpi eq, %arg1, %c0_i32_44 : i32
    %66 = arith.extui %65 : i1 to i32
    %c0_i32_45 = arith.constant 0 : i32
    %67 = arith.cmpi ne, %66, %c0_i32_45 : i32
    scf.if %67 {
      %c0_46 = arith.constant 0 : index
      %c0_47 = arith.constant 0 : index
      %c0_48 = arith.constant 0 : index
      %68 = vector.load %arg5[%c0_46, %c0_47, %c0_48] : memref<2x1x128xf32, #tpu.memory_space<vmem>>, vector<2x1x128xf32>
      %cst_49 = arith.constant dense<0.000000e+00> : vector<2x128xf32>
      %69 = vector.multi_reduction <add>, %68, %cst_49 [1] : vector<2x1x128xf32> to vector<2x128xf32>
      %70 = vector.shape_cast %69 : vector<2x128xf32> to vector<1x2x128xf32>
      %c0_50 = arith.constant 0 : index
      %c0_51 = arith.constant 0 : index
      %c0_52 = arith.constant 0 : index
      %71 = vector.load %arg4[%c0_50, %c0_51, %c0_52] : memref<1x2x128xf32, #tpu.memory_space<vmem>>, vector<1x2x128xf32>
      tpu.vector_store %arg4[%c0_50, %c0_51, %c0_52], %70 {strides = array<i32>} : memref<1x2x128xf32, #tpu.memory_space<vmem>>, vector<1x2x128xf32>,
    } else {
    }
    return
  }
  func.func @transform_0(%arg0: i32, %arg1: i32) -> (i32, i32, i32, i32) {
    %c1_i32 = arith.constant 1 : i32
    %0 = arith.muli %arg0, %c1_i32 : i32
    %1 = arith.addi %0, %arg1 : i32
    %c0_i32 = arith.constant 0 : i32
    %c0_i32_0 = arith.constant 0 : i32
    %c0_i32_1 = arith.constant 0 : i32
    %c0_i32_2 = arith.constant 0 : i32
    return %c0_i32, %c0_i32_0, %1, %c0_i32_1 : i32, i32, i32, i32
  }
  func.func @transform_1(%arg0: i32, %arg1: i32) -> (i32, i32, i32) {
    %c1_i32 = arith.constant 1 : i32
    %0 = arith.muli %arg0, %c1_i32 : i32
    %1 = arith.addi %0, %arg1 : i32
    %c0_i32 = arith.constant 0 : i32
    %c0_i32_0 = arith.constant 0 : i32
    %c0_i32_1 = arith.constant 0 : i32
    return %c0_i32, %1, %c0_i32_0 : i32, i32, i32
  }
  func.func @transform_2(%arg0: i32, %arg1: i32) -> (i32, i32, i32) {
    %c0_i32 = arith.constant 0 : i32
    %c0_i32_0 = arith.constant 0 : i32
    %c0_i32_1 = arith.constant 0 : i32
    return %arg0, %c0_i32, %c0_i32_0 : i32, i32, i32
  }
}

</mosaic_0001>

<bundles_post_ra>
// kernel: tpu_custom_call.1
= control target key start
LH: loop header
LB: loop body
LE: loop exit
PB: predicated region body
PF: predicated region fallthrough
CT: control target
= control target key end

     0   :  { %7 = vsyncpa [#allocation4], 0  ;;  %s324_s0 = inlined_call_operand.hbm [shape: f32[2,4,2,128], index: 0, kind: input, shape index: {}]   ;;  %s325_s1 = inlined_call_operand.vmem [shape: s8[2,2,128], index: 1, kind: input, shape index: {}]   ;;  %s326_s2 = inlined_call_operand.hbm [shape: f32[1,2,128], index: 2, kind: output, shape index: {}]  }
   0x1   :  { %8 = vsyncpa [#allocation5], 0  ;;  %s273_s9 = smov [#allocation3]   ;;  %s225_s13 = scalar_lea.hbm %s324_s0, 256 }
   0x2   :  { %s17_s10 = sshll.u32 %s273_s9, 4  ;;  %p226_p0 = scmp.ne.s32.totalorder %s324_s0, %s225_s13  ;;  %s18_s10 = int_to_ptr.vmem [resolvable:$true] %s17_s10 }
   0x3   :  { %p229_p1 = scmp.lt.u32.totalorder %s225_s13, %s324_s0 }
   0x5   :  { %p231_p2 = pnand %p229_p1, %p226_p0 }
   0x7   :  { %234 = shalt.err (!%p231_p2)
}
   0x8   :  { %s235_s18 = scalar_lea.vmem %s18_s10, 256  ;;  %p240_p4 = scmp.lt.s32.totalorder %s18_s10, %s18_s10 }
   0x9   :  { %p236_p3 = scmp.ne.s32.totalorder %s18_s10, %s235_s18  ;;  %p241_p5 = scmp.lt.s32.totalorder %s235_s18, %s235_s18 }
   0xb   :  { %p242_p6 = por %p241_p5, %p240_p4 }
   0xd   :  { %p243_p7 = pnand %p242_p6, %p236_p3 }
   0xf   :  { %246 = shalt.err (!%p243_p7)
}
  0x10   :  { %s274_s19 = smov 32   ;;  %s275_s20 = smov 2  }
  0x11   :  { %23 = dma.hbm_to_vmem [thread:$0]  %s324_s0, 256, %s18_s10, [#allocation4], %s274_s19, %s274_s19, %s275_s20  }
  0x12   :  { %269 = dma.done.wait [#allocation4], 256  }
  0x13   :  { %270 = vsyncadd [#allocation4], 4294967040  ;;  %v276_v0 = vmov 0.0   ;;  %v54_v1 = vld [vmem:[#allocation3] sm:$0x3]  ;;  %vm133_vm8 = vcmask 1041408  }
  0x14   :  { %48 = vst [vmem:[#allocation2] sm:$0x1] %v276_v0  ;;  %49 = vst [vmem:[#allocation2 + $0x1] sm:$0x1] %v276_v0  ;;  %v57_v2 = vld [vmem:[#allocation3 + $0x2] sm:$0x3] }
  0x15   :  { %v59_v3 = vmax.f32 %v54_v1, %v57_v2  ;;  %v62_v4 = vld [vmem:[#allocation3 + $0x4] sm:$0x3]  ;;  %v67_v5 = vld [vmem:[#allocation3 + $0x6] sm:$0x3]  ;;  %v55_v6 = vld [vmem:[#allocation3 + $0x8] sm:$0x3] }
  0x16   :  { %v58_v7 = vld [vmem:[#allocation3 + $0xa] sm:$0x3]  ;;  %v63_v9 = vld [vmem:[#allocation3 + $0xc] sm:$0x3]  ;;  %v68_v12 = vld [vmem:[#allocation3 + $0xe] sm:$0x3] }
  0x17   :  { %v64_v8 = vmax.f32 %v59_v3, %v62_v4  ;;  %v60_v10 = vmax.f32 %v55_v6, %v58_v7  ;;  %v50_v32 = vld [vmem:[%s325_s1] sm:$0x1]  ;;  %v51_v40 = vld [vmem:[%s325_s1 + $0x1] sm:$0x1]  ;;  %s278_s1 = smov [#allocation6]  }
  0x18   :  { %v52_v37 = vunpack.c.0.s8 %v50_v32  ;;  %v53_v46 = vunpack.c.0.s8 %v51_v40  ;;  %s186_s26 = sshll.u32 %s278_s1, 4  ;;  %s187_s26 = int_to_ptr.vmem [resolvable:$true] %s186_s26 }
  0x19   :  { %v69_v11 = vmax.f32 %v64_v8, %v67_v5  ;;  %v65_v13 = vmax.f32 %v60_v10, %v63_v9  ;;  %s247_s27 = scalar_lea.vmem %s187_s26, 32  ;;  %p252_p9 = scmp.lt.s32.totalorder %s187_s26, %s187_s26 }
  0x1a   :  { %vm77_vm0 = vcmp.eq.s32.totalorder %v52_v37, 0  ;;  %vm89_vm1 = vcmp.eq.s32.totalorder %v52_v37, 1  ;;  %vm103_vm2 = vcmp.eq.s32.totalorder %v52_v37, 2  ;;  %vm78_vm3 = vcmp.eq.s32.totalorder %v53_v46, 0  ;;  %p248_p8 = scmp.ne.s32.totalorder %s187_s26, %s247_s27  ;;  %p253_p10 = scmp.lt.s32.totalorder %s247_s27, %s247_s27 }
  0x1b   :  { %v71_v14 = vsub.f32 %v54_v1, %v69_v11  ;;  %v81_v15 = vsub.f32 %v57_v2, %v69_v11  ;;  %v95_v16 = vsub.f32 %v62_v4, %v69_v11  ;;  %v109_v17 = vsub.f32 %v67_v5, %v69_v11 }
  0x1c   :  { %v70_v18 = vmax.f32 %v65_v13, %v68_v12  ;;  %vm90_vm4 = vcmp.eq.s32.totalorder %v53_v46, 1  ;;  %vm117_vm5 = vcmp.eq.s32.totalorder %v52_v37, 3  ;;  %vm104_vm6 = vcmp.eq.s32.totalorder %v53_v46, 2  ;;  %p254_p11 = por %p253_p10, %p252_p9 }
  0x1d   :  { %v73_v19 = vmul.f32 1.442695, %v71_v14  ;;  %v83_v20 = vmul.f32 1.442695, %v81_v15  ;;  %v97_v21 = vmul.f32 1.442695, %v95_v16 }
  0x1e   :  { %v111_v22 = vmul.f32 1.442695, %v109_v17  ;;  %v72_v23 = vsub.f32 %v55_v6, %v70_v18  ;;  %v82_v24 = vsub.f32 %v58_v7, %v70_v18  ;;  %v96_v25 = vsub.f32 %v63_v9, %v70_v18  ;;  %p255_p12 = pnand %p254_p11, %p248_p8 }
  0x1f   :  { %205 = vpow2.f32 %v73_v19  ;;  %v110_v26 = vsub.f32 %v68_v12, %v70_v18  ;;  %vm118_vm7 = vcmp.eq.s32.totalorder %v53_v46, 3  ;;  %v148_v19 = vld [vmem:[#allocation2] sm:$0x1] }
  0x20   :  { %207 = vpow2.f32 %v83_v20  ;;  %v75_v27 = vmul.f32 1.442695, %v72_v23  ;;  %v85_v28 = vmul.f32 1.442695, %v82_v24  ;;  %v99_v29 = vmul.f32 1.442695, %v96_v25 }
  0x21   :  { %209 = vpow2.f32 %v97_v21  ;;  %v113_v30 = vmul.f32 1.442695, %v110_v26  ;;  %v149_v24 = vld [vmem:[#allocation2 + $0x1] sm:$0x1] }
  0x22   :  { %211 = vpow2.f32 %v111_v22 }
  0x23   :  { %213 = vpow2.f32 %v75_v27  ;;  %v277_v27 = vmov 1966171168  }
  0x24   :  { %215 = vpow2.f32 %v85_v28  ;;  %v165_v28 = vunpack.c.l.s4 %v277_v27 }
  0x25   :  { %217 = vpow2.f32 %v99_v29  ;;  %v167_v29 = vlaneseq }
  0x26   :  { %219 = vpow2.f32 %v113_v30  ;;  %v166_v30 = vunpack.c.0.s8 %v165_v28 }
  0x29   :  { %v206_v31 = vpop.eup %205 }
  0x2a   :  { %v208_v33 = vpop.eup %207  ;;  %v79_v48 = vsel %vm77_vm0, %v206_v31, 0.0 }
  0x2b   :  { %v210_v34 = vpop.eup %209  ;;  %v87_v35 = vadd.f32 %v208_v33, %v206_v31  ;;  %v91_v49 = vsel %vm89_vm1, %v208_v33, 0.0  ;;  %v168_v31 = vshrl.u32 %v167_v29, 7 }
  0x2c   :  { %v212_v36 = vpop.eup %211  ;;  %v93_v51 = vadd.f32 %v91_v49, %v79_v48  ;;  %v105_v52 = vsel %vm103_vm2, %v210_v34, 0.0 }
  0x2d   :  { %v214_v38 = vpop.eup %213  ;;  %v101_v39 = vadd.f32 %v210_v34, %v87_v35  ;;  %v119_v58 = vsel %vm117_vm5, %v212_v36, 0.0  ;;  %v169_v33 = vsub.s32 %v166_v30, %v168_v31 }
  0x2e   :  { %v216_v41 = vpop.eup %215  ;;  %v80_v53 = vsel %vm78_vm3, %v214_v38, 0.0  ;;  %v107_v55 = vadd.f32 %v105_v52, %v93_v51 }
  0x2f   :  { %v218_v42 = vpop.eup %217  ;;  %v115_v43 = vadd.f32 %v212_v36, %v101_v39  ;;  %v88_v44 = vadd.f32 %v216_v41, %v214_v38  ;;  %v92_v54 = vsel %vm90_vm4, %v216_v41, 0.0 }
  0x30   :  { %v220_v45 = vpop.eup %219  ;;  %v94_v56 = vadd.f32 %v92_v54, %v80_v53  ;;  %v106_v59 = vsel %vm104_vm6, %v218_v42, 0.0  ;;  %v121_v61 = vadd.f32 %v119_v58, %v107_v55 }
  0x31   :  { %221 = vrcp.f32 %v115_v43  ;;  %v102_v47 = vadd.f32 %v218_v42, %v88_v44  ;;  %v120_v1 = vsel %vm118_vm7, %v220_v45, 0.0 }
  0x32   :  { %v108_v63 = vadd.f32 %v106_v59, %v94_v56 }
  0x33   :  { %v116_v50 = vadd.f32 %v220_v45, %v102_v47 }
  0x34   :  { %v122_v5 = vadd.f32 %v120_v1, %v108_v63 }
  0x35   :  { %223 = vrcp.f32 %v116_v50 }
  0x3b   :  { %v222_v57 = vpop.eup %221 }
  0x3c   :  { %v125_v60 = vmul.f32 %v222_v57, %v115_v43 }
  0x3e   :  { %v127_v62 = vsub.f32 2.0, %v125_v60 }
  0x3f   :  { %v224_v0 = vpop.eup %223 }
  0x40   :  { %v129_v2 = vmul.f32 %v222_v57, %v127_v62  ;;  %v126_v3 = vmul.f32 %v224_v0, %v116_v50 }
  0x42   :  { %v131_v4 = vmul.f32 %v129_v2, %v121_v61  ;;  %v128_v6 = vsub.f32 2.0, %v126_v3 }
  0x44   :  { %v134_v7 = vsel %vm133_vm8, %v131_v4, 0.0  ;;  %v130_v8 = vmul.f32 %v224_v0, %v128_v6 }
  0x45   :  { %v135_v9 = vrot.slane %v134_v7, 4 }
  0x46   :  { %v132_v10 = vmul.f32 %v130_v8, %v122_v5 }
  0x47   :  { %v136_v11 = vadd.f32 %v135_v9, %v134_v7 }
  0x48   :  { %v141_v12 = vsel %vm133_vm8, %v132_v10, 0.0 }
  0x49   :  { %v137_v13 = vrot.slane %v136_v11, 2  ;;  %v142_v14 = vrot.slane %v141_v12, 4 }
  0x4b   :  { %v138_v15 = vadd.f32 %v137_v13, %v136_v11  ;;  %v143_v16 = vadd.f32 %v142_v14, %v141_v12 }
  0x4d   :  { %v139_v17 = vrot.slane %v138_v15, 1  ;;  %v144_v18 = vrot.slane %v143_v16, 2 }
  0x4f   :  { %v140_v20 = vadd.f32 %v139_v17, %v138_v15  ;;  %v145_v21 = vadd.f32 %v144_v18, %v143_v16 }
  0x51   :  { %v150_v22 = vadd.f32 %v148_v19, %v140_v20  ;;  %v146_v23 = vrot.slane %v145_v21, 1 }
  0x53   :  { %152 = vst [vmem:[#allocation2] sm:$0x1] %v150_v22  ;;  %v147_v25 = vadd.f32 %v146_v23, %v145_v21 }
  0x55   :  { %v151_v26 = vadd.f32 %v149_v24, %v147_v25 }
  0x57   :  { %153 = vst [vmem:[#allocation2 + $0x1] sm:$0x1] %v151_v26 }
  0x5a   :  { %v157_v32 = vld [vmem:[#allocation2] sm:$0x1] }
  0x5e   :  { %v158_v34 = vld [vmem:[#allocation2 + $0x1] sm:$0x1] }
  0x5f   :  { %v163_v35 = vcombine.low %v157_v32, %v158_v34 }
  0x61   :  { %v170_v36 = vrot.slane %v163_v35, %v169_v33 }
  0x63   :  { %198 = vst.sshfl [vmem:[#allocation6] sm:$0x5 pattern:$0x73625140] %v170_v36 }
  0x64   :  { %258 = shalt.err (!%p255_p12)
}
  0x65   :  { %s259_s30 = scalar_lea.hbm %s326_s2, 32 }
  0x66   :  { %p260_p13 = scmp.ne.s32.totalorder %s326_s2, %s259_s30  ;;  %p263_p0 = scmp.lt.u32.totalorder %s259_s30, %s326_s2 }
  0x68   :  { %p265_p1 = pnand %p263_p0, %p260_p13 }
  0x6a   :  { %268 = shalt.err (!%p265_p1)
}
  0x6b   :  { %189 = dma.vmem_to_hbm [thread:$0]  %s187_s26, 32, %s326_s2, [#allocation5]  }
  0x6c   :  { %271 = dma.done.wait [#allocation5], 32  }
  0x6d   :  { %272 = vsyncadd [#allocation5], 4294967264 }
  0x6e   :  { %193 = vsyncpa [#allocation4], 1 }
  0x6f   :  { %194 = vsyncpa [#allocation5], 1 }

</bundles_post_ra>
